<compile_context>
chip_gen: v7x
topology: tpu7x:2x2x1
jax: 0.10.0
libtpu: 0.0.40
codegen_flags: <defaults>
</compile_context>

<pallas_src>
import functools

import jax
import jax.numpy as jnp
from jax.experimental import pallas as pl
from jax.experimental.pallas import tpu as pltpu

IN_F, HID_F, OUT_F = 10, 20, 30


def mlp_kernel(x_ref, w1_ref, b1_ref, w2_ref, b2_ref, o_ref):
    # First linear: (TM, 10) @ (10, 20) + (1, 20), ReLU.
    h = jnp.dot(x_ref[...], w1_ref[...], preferred_element_type=jnp.float32)
    h = jnp.maximum(h + b1_ref[...], 0.0)
    # Second linear: (TM, 20) @ (20, 30) + (1, 30).
    out = jnp.dot(h, w2_ref[...], preferred_element_type=jnp.float32)
    o_ref[...] = (out + b2_ref[...]).astype(o_ref.dtype)


def _vmem_capacity_bytes():
    """Physical VMEM per core; conservative fallback if the query fails."""
    try:
        info = pltpu.get_tpu_info()
        cap = getattr(info, "vmem_capacity_bytes", None)
        if cap:
            return int(cap)
    except Exception:
        pass
    return 64 * 1024 * 1024  # v7x per-TensorCore VMEM (smallest of the generations)


@functools.partial(jax.jit, static_argnames=("tm",))
def complex_data_structures_model(x, w1, b1, w2, b2, tm=None):
    """x: (B, 10) f32; w1: (10, 20); b1: (20,); w2: (20, 30); b2: (30,)."""
    B, in_f = x.shape
    hid = w1.shape[1]
    out_f = w2.shape[1]

    # ---- Batch tile selection -------------------------------------------------
    if tm is None:
        # Large default tile: amortizes the fixed per-grid-step pipeline cost.
        tm = 8192
    if B <= tm:
        # Single block covering the whole batch. Block dim 0 equals the full
        # array dim, so no 8-row alignment / padding is required.
        tm = B
        n_tiles = 1
    else:
        # Multi-tile: tile rows must be a multiple of 8 (f32 sublane rule).
        tm = max(8, (tm // 8) * 8)
        # Non-divisible B is fine: Pallas pads the last input block (values
        # unused for in-bounds rows) and drops out-of-bounds output writes.
        n_tiles = pl.cdiv(B, tm)

    # ---- VMEM budget (lane-padding aware) --------------------------------------
    lane = 128
    # x and out tiles each pad to (tm, 128) f32 = tm*512 B; 2 buffers each.
    stream_bytes = 2 * 2 * tm * lane * 4
    resident_bytes = 4 * 4 * 8 * lane * 4  # weights/biases, generously padded (tiny)
    vmem_cap = _vmem_capacity_bytes()
    vmem_limit = stream_bytes + resident_bytes + (4 << 20)      # + headroom
    vmem_limit = min(vmem_limit, max(vmem_cap - (8 << 20), 24 << 20))
    vmem_limit = max(vmem_limit, 16 << 20)

    # ---- Cost estimate (bandwidth-dominated, tiny flops) ------------------------
    flops = 2 * B * (in_f * hid + hid * out_f)
    bytes_accessed = 4 * (B * (in_f + out_f) + in_f * hid + hid + hid * out_f + out_f)
    cost = pl.CostEstimate(flops=flops, bytes_accessed=bytes_accessed, transcendentals=0)

    # Biases as (1, N) rows so they broadcast over the batch inside the kernel.
    b1_2d = b1.reshape(1, hid)
    b2_2d = b2.reshape(1, out_f)

    return pl.pallas_call(
        mlp_kernel,
        out_shape=jax.ShapeDtypeStruct((B, out_f), x.dtype),
        grid=(n_tiles,),
        in_specs=[
            # Batch-tiled activation stream (double-buffered by Pallas).
            pl.BlockSpec((tm, in_f), lambda i: (i, 0)),
            # Weights/biases: single full blocks, constant index_map -> resident
            # in VMEM across all grid steps (no re-DMA).
            pl.BlockSpec((in_f, hid), lambda i: (0, 0)),
            pl.BlockSpec((1, hid), lambda i: (0, 0)),
            pl.BlockSpec((hid, out_f), lambda i: (0, 0)),
            pl.BlockSpec((1, out_f), lambda i: (0, 0)),
        ],
        out_specs=pl.BlockSpec((tm, out_f), lambda i: (i, 0)),
        compiler_params=pltpu.CompilerParams(
            dimension_semantics=("parallel",),
            vmem_limit_bytes=int(vmem_limit),
        ),
        cost_estimate=cost,
    )(x, w1, b1_2d, w2, b2_2d)


def init_params(key):
    """Deterministic params matching nn.Linear(10,20)/(20,30) shapes.

    PyTorch stores weight as (out, in); we keep the transposed (in, out) layout
    so the kernel computes plain x @ W + b.
    """
    k1, k2, k3, k4 = jax.random.split(key, 4)
    w1 = jax.random.uniform(k1, (IN_F, HID_F), jnp.float32, -0.3, 0.3)
    b1 = jax.random.uniform(k2, (HID_F,), jnp.float32, -0.3, 0.3)
    w2 = jax.random.uniform(k3, (HID_F, OUT_F), jnp.float32, -0.2, 0.2)
    b2 = jax.random.uniform(k4, (OUT_F,), jnp.float32, -0.2, 0.2)
    return w1, b1, w2, b2


def _reference(x, w1, b1, w2, b2):
    return jnp.maximum(x @ w1 + b1, 0.0) @ w2 + b2


if __name__ == "__main__":
    key = jax.random.PRNGKey(0)
    kx, kx2, kx3, kp = jax.random.split(key, 4)
    w1, b1, w2, b2 = init_params(kp)

    # Small-batch check: single full-extent block, B multiple of 8.
    x = jax.random.normal(kx, (8, IN_F), jnp.float32)
    out = jax.block_until_ready(complex_data_structures_model(x, w1, b1, w2, b2))
    assert out.shape == (8, OUT_F), out.shape
    assert jnp.allclose(out, _reference(x, w1, b1, w2, b2), atol=1e-5, rtol=1e-5), "mismatch (B=8)"

    # Ragged single-block check: B not a multiple of 8.
    x3 = jax.random.normal(kx3, (5, IN_F), jnp.float32)
    out3 = jax.block_until_ready(complex_data_structures_model(x3, w1, b1, w2, b2))
    assert out3.shape == (5, OUT_F), out3.shape
    assert jnp.allclose(out3, _reference(x3, w1, b1, w2, b2), atol=1e-5, rtol=1e-5), "mismatch (B=5)"

    # Multi-tile check exercising the ragged last block (B=200, tm=64 -> 4 tiles,
    # last tile has 8 valid rows) with no wrapper pad/slice.
    x2 = jax.random.normal(kx2, (200, IN_F), jnp.float32)
    out2 = jax.block_until_ready(complex_data_structures_model(x2, w1, b1, w2, b2, tm=64))
    assert out2.shape == (200, OUT_F), out2.shape
    assert jnp.allclose(out2, _reference(x2, w1, b1, w2, b2), atol=1e-5, rtol=1e-5), "mismatch (B=200)"

    print("KERNEL_OK")
</pallas_src>

<mosaic_0001>
module attributes {stable_mosaic.version = 11 : i64} {
  func.func @mlp_kernel(%arg0: i32, %arg1: memref<8x10xf32, #tpu.memory_space<vmem>>, %arg2: memref<10x20xf32, #tpu.memory_space<vmem>>, %arg3: memref<1x20xf32, #tpu.memory_space<vmem>>, %arg4: memref<20x30xf32, #tpu.memory_space<vmem>>, %arg5: memref<1x30xf32, #tpu.memory_space<vmem>>, %arg6: memref<8x30xf32, #tpu.memory_space<vmem>>) attributes {dimension_semantics = [#tpu.dimension_semantics<parallel>], iteration_bounds = array<i64: 1>, scalar_prefetch = 0 : i64, scratch_operands = 0 : i64, tpu.core_type = #tpu.core_type<tc>, window_params = [{transform_indices = @transform_0, window_bounds = array<i64: 8, 10>}, {pipeline_mode = #tpu.pipeline_mode<synchronous>, transform_indices = @transform_1, window_bounds = array<i64: 10, 20>}, {pipeline_mode = #tpu.pipeline_mode<synchronous>, transform_indices = @transform_2, window_bounds = array<i64: 1, 20>}, {pipeline_mode = #tpu.pipeline_mode<synchronous>, transform_indices = @transform_3, window_bounds = array<i64: 20, 30>}, {pipeline_mode = #tpu.pipeline_mode<synchronous>, transform_indices = @transform_4, window_bounds = array<i64: 1, 30>}, {transform_indices = @transform_5, window_bounds = array<i64: 8, 30>}]} {
    %c0 = arith.constant 0 : index
    %c0_0 = arith.constant 0 : index
    %0 = vector.load %arg1[%c0, %c0_0] : memref<8x10xf32, #tpu.memory_space<vmem>>, vector<8x10xf32>
    %c0_1 = arith.constant 0 : index
    %c0_2 = arith.constant 0 : index
    %1 = vector.load %arg2[%c0_1, %c0_2] : memref<10x20xf32, #tpu.memory_space<vmem>>, vector<10x20xf32>
    %cst = arith.constant dense<0.000000e+00> : vector<8x20xf32>
    %2 = tpu.matmul %0, %1, %cst {dimension_numbers = #tpu.dot_dimension_numbers<[1], [0], [0], [1], [0, 0, 1, 1], [], []>} : vector<8x10xf32>, vector<10x20xf32>, vector<8x20xf32> -> vector<8x20xf32>
    %c0_3 = arith.constant 0 : index
    %c0_4 = arith.constant 0 : index
    %3 = vector.load %arg3[%c0_3, %c0_4] : memref<1x20xf32, #tpu.memory_space<vmem>>, vector<1x20xf32>
    %4 = vector.broadcast %3 : vector<1x20xf32> to vector<8x20xf32>
    %5 = arith.addf %2, %4 : vector<8x20xf32>
    %cst_5 = arith.constant 0.000000e+00 : f32
    %6 = vector.broadcast %cst_5 : f32 to vector<8x20xf32>
    %7 = arith.maximumf %5, %6 : vector<8x20xf32>
    %c0_6 = arith.constant 0 : index
    %c0_7 = arith.constant 0 : index
    %8 = vector.load %arg4[%c0_6, %c0_7] : memref<20x30xf32, #tpu.memory_space<vmem>>, vector<20x30xf32>
    %cst_8 = arith.constant dense<0.000000e+00> : vector<8x30xf32>
    %9 = tpu.matmul %7, %8, %cst_8 {dimension_numbers = #tpu.dot_dimension_numbers<[1], [0], [0], [1], [0, 0, 1, 1], [], []>} : vector<8x20xf32>, vector<20x30xf32>, vector<8x30xf32> -> vector<8x30xf32>
    %c0_9 = arith.constant 0 : index
    %c0_10 = arith.constant 0 : index
    %10 = vector.load %arg5[%c0_9, %c0_10] : memref<1x30xf32, #tpu.memory_space<vmem>>, vector<1x30xf32>
    %11 = vector.broadcast %10 : vector<1x30xf32> to vector<8x30xf32>
    %12 = arith.addf %9, %11 : vector<8x30xf32>
    %c0_11 = arith.constant 0 : index
    %c0_12 = arith.constant 0 : index
    %13 = vector.load %arg6[%c0_11, %c0_12] : memref<8x30xf32, #tpu.memory_space<vmem>>, vector<8x30xf32>
    tpu.vector_store %arg6[%c0_11, %c0_12], %12 {strides = array<i32>} : memref<8x30xf32, #tpu.memory_space<vmem>>, vector<8x30xf32>,
    return
  }
  func.func @transform_0(%arg0: i32) -> (i32, i32) {
    %c0_i32 = arith.constant 0 : i32
    %c0_i32_0 = arith.constant 0 : i32
    return %arg0, %c0_i32 : i32, i32
  }
  func.func @transform_1(%arg0: i32) -> (i32, i32) {
    %c0_i32 = arith.constant 0 : i32
    %c0_i32_0 = arith.constant 0 : i32
    %c0_i32_1 = arith.constant 0 : i32
    return %c0_i32, %c0_i32_0 : i32, i32
  }
  func.func @transform_2(%arg0: i32) -> (i32, i32) {
    %c0_i32 = arith.constant 0 : i32
    %c0_i32_0 = arith.constant 0 : i32
    %c0_i32_1 = arith.constant 0 : i32
    return %c0_i32, %c0_i32_0 : i32, i32
  }
  func.func @transform_3(%arg0: i32) -> (i32, i32) {
    %c0_i32 = arith.constant 0 : i32
    %c0_i32_0 = arith.constant 0 : i32
    %c0_i32_1 = arith.constant 0 : i32
    return %c0_i32, %c0_i32_0 : i32, i32
  }
  func.func @transform_4(%arg0: i32) -> (i32, i32) {
    %c0_i32 = arith.constant 0 : i32
    %c0_i32_0 = arith.constant 0 : i32
    %c0_i32_1 = arith.constant 0 : i32
    return %c0_i32, %c0_i32_0 : i32, i32
  }
  func.func @transform_5(%arg0: i32) -> (i32, i32) {
    %c0_i32 = arith.constant 0 : i32
    %c0_i32_0 = arith.constant 0 : i32
    return %arg0, %c0_i32 : i32, i32
  }
}

</mosaic_0001>

<bundles_post_ra>
// kernel: complex_data_structures_model.1
= control target key start
LH: loop header
LB: loop body
LE: loop exit
PB: predicated region body
PF: predicated region fallthrough
CT: control target
= control target key end

     0   :  { %10 = vsyncpa [#allocation3], 0  ;;  %s495_s0 = inlined_call_operand.hbm [shape: f32[8,10], index: 0, kind: input, shape index: {}]   ;;  %s496_s1 = inlined_call_operand.hbm [shape: f32[10,20], index: 1, kind: input, shape index: {}]   ;;  %s497_s2 = inlined_call_operand.vmem [shape: f32[1,20], index: 2, kind: input, shape index: {}]   ;;  %s498_s3 = inlined_call_operand.hbm [shape: f32[20,30], index: 3, kind: input, shape index: {}]   ;;  %s499_s4 = inlined_call_operand.vmem [shape: f32[1,30], index: 4, kind: input, shape index: {}]   ;;  %s500_s5 = inlined_call_operand.hbm [shape: f32[8,30], index: 5, kind: output, shape index: {}]  }
   0x1   :  { %11 = vsyncpa [#allocation6], 0 }
   0x2   :  { %12 = vsyncpa [#allocation4], 0  ;;  %s395_s18 = smov [#allocation5]   ;;  %s301_s22 = scalar_lea.hbm %s496_s1, 256 }
   0x3   :  { %s28_s19 = sshll.u32 %s395_s18, 4  ;;  %p302_p0 = scmp.ne.s32.totalorder %s496_s1, %s301_s22  ;;  %s29_s19 = int_to_ptr.vmem [resolvable:$true] %s28_s19 }
   0x4   :  { %p305_p1 = scmp.lt.u32.totalorder %s301_s22, %s496_s1 }
   0x6   :  { %p307_p2 = pnand %p305_p1, %p302_p0 }
   0x8   :  { %310 = shalt.err (!%p307_p2)
}
   0x9   :  { %s311_s27 = scalar_lea.vmem %s29_s19, 256  ;;  %p316_p4 = scmp.lt.s32.totalorder %s29_s19, %s29_s19 }
   0xa   :  { %p312_p3 = scmp.ne.s32.totalorder %s29_s19, %s311_s27  ;;  %p317_p5 = scmp.lt.s32.totalorder %s311_s27, %s311_s27 }
   0xc   :  { %p318_p6 = por %p317_p5, %p316_p4 }
   0xe   :  { %p319_p7 = pnand %p318_p6, %p312_p3 }
  0x10   :  { %322 = shalt.err (!%p319_p7)
}
  0x11   :  { %s396_s28 = smov 128   ;;  %s397_s29 = smov 8  }
  0x12   :  { %34 = dma.hbm_to_vmem [thread:$0]  %s496_s1, 256, %s29_s19, [#allocation6], %s396_s28, %s396_s28, %s397_s29  }
  0x13   :  { %s398_s7 = smov [#allocation2]   ;;  %s399_s9 = smov [#allocation7]  }
  0x14   :  { %s19_s8 = sshll.u32 %s398_s7, 4  ;;  %s42_s10 = sshll.u32 %s399_s9, 4  ;;  %s20_s8 = int_to_ptr.vmem [resolvable:$true] %s19_s8  ;;  %s43_s10 = int_to_ptr.vmem [resolvable:$true] %s42_s10 }
  0x15   :  { %s323_s13 = scalar_lea.hbm %s495_s0, 128 }
  0x16   :  { %p324_p8 = scmp.ne.s32.totalorder %s495_s0, %s323_s13  ;;  %p327_p9 = scmp.lt.u32.totalorder %s323_s13, %s495_s0 }
  0x18   :  { %p329_p10 = pnand %p327_p9, %p324_p8 }
  0x1a   :  { %332 = shalt.err (!%p329_p10)
}
  0x1b   :  { %s333_s1 = scalar_lea.vmem %s20_s8, 128  ;;  %p338_p12 = scmp.lt.s32.totalorder %s20_s8, %s20_s8 }
  0x1c   :  { %p334_p11 = scmp.ne.s32.totalorder %s20_s8, %s333_s1  ;;  %p339_p13 = scmp.lt.s32.totalorder %s333_s1, %s333_s1 }
  0x1e   :  { %p340_p0 = por %p339_p13, %p338_p12 }
  0x20   :  { %p341_p1 = pnand %p340_p0, %p334_p11 }
  0x22   :  { %344 = shalt.err (!%p341_p1)
}
  0x23   :  { %22 = dma.hbm_to_vmem [thread:$0]  %s495_s0, 128, %s20_s8, [#allocation3]  }
  0x24   :  { %s345_s22 = scalar_lea.hbm %s498_s3, 384 }
  0x25   :  { %p346_p2 = scmp.ne.s32.totalorder %s498_s3, %s345_s22  ;;  %p349_p3 = scmp.lt.u32.totalorder %s345_s22, %s498_s3 }
  0x27   :  { %p351_p4 = pnand %p349_p3, %p346_p2 }
  0x29   :  { %354 = shalt.err (!%p351_p4)
}
  0x2a   :  { %s355_s27 = scalar_lea.vmem %s43_s10, 384  ;;  %p360_p6 = scmp.lt.s32.totalorder %s43_s10, %s43_s10 }
  0x2b   :  { %p356_p5 = scmp.ne.s32.totalorder %s43_s10, %s355_s27  ;;  %p361_p7 = scmp.lt.s32.totalorder %s355_s27, %s355_s27 }
  0x2d   :  { %p362_p8 = por %p361_p7, %p360_p6 }
  0x2f   :  { %p363_p9 = pnand %p362_p8, %p356_p5 }
  0x31   :  { %366 = shalt.err (!%p363_p9)
}
  0x32   :  { %48 = dma.hbm_to_vmem [thread:$0]  %s498_s3, 384, %s43_s10, [#allocation6], %s396_s28, %s396_s28, %s397_s29  }
  0x33   :  { %389 = dma.done.wait [#allocation3], 128  }
  0x34   :  { %390 = vsyncadd [#allocation3], 4294967168 }
  0x35   :  { %391 = dma.done.wait [#allocation6], 640  }
  0x36   :  { %392 = vsyncadd [#allocation6], 4294966656  ;;  %v400_v0 = vmov 0.0|0.0   ;;  %vm401_vm0 = vmmov 0   ;;  %v402_v1 = vmov 0.0   ;;  %vm74_vm1 = vcmask 1041408  }
  0x37   :  { %284 = vmatprep.subr.bf16.mxu0 %v400_v0  ;;  %288 = vmatprep.subr.bf16.mxu1 %v400_v0  ;;  %v61_v2 = vld [vmem:[#allocation5] sm:$0xff]  ;;  %v62_v3 = vld [vmem:[#allocation5 + $0x8] sm:$0x3]  ;;  %vm403_vm2 = vmmov 1   ;;  %v60_v5 = vld [vmem:[#allocation2] sm:$0xff]  ;;  %vm70_vm4 = vcmask 80896  }
  0x38   :  { %272 = vmatprep.mubr.msk.f32.mxu0 %vm401_vm0, %v402_v1  ;;  %281 = vmatprep.mubr.msk.f32.mxu1 %vm401_vm0, %v402_v1  ;;  %vm286_vm3 = vmpackc.low %vm74_vm1, %vm403_vm2  ;;  %v285_v4 = vpack.c.bf16 %v62_v3, %v61_v2  ;;  %v149_v6 = vld [vmem:[#allocation7] sm:$0xff]  ;;  %v150_v7 = vld [vmem:[#allocation7 + $0x8] sm:$0xff]  ;;  %vm163_vm5 = vcmask 1043456   ;;  %vm159_vm6 = vcmask 162816   ;;  %s404_s7 = smov [#allocation8]   ;;  %vm237_vm7 = vcmask 244736  }
  0x39   :  { %v289_v8 = vpack.c.bf16 %v150_v7, %v149_v6  ;;  %v151_v9 = vld [vmem:[#allocation7 + $0x10] sm:$0xf]  ;;  %v255_v10 = vld [vmem:[%s497_s2] ss:$0 sm:$0xff]  ;;  %s245_s8 = sshll.u32 %s404_s7, 4  ;;  %s246_s8 = int_to_ptr.vmem [resolvable:$true] %s245_s8 }
  0x3a   :  { %287 = vmatpush3.bf16.msk.msra.mxu0 %vm286_vm3, %v285_v4  ;;  %v258_v15 = vld [vmem:[%s499_s4] ss:$0 sm:$0xff]  ;;  %s367_s9 = scalar_lea.vmem %s246_s8, 128  ;;  %p372_p11 = scmp.lt.s32.totalorder %s246_s8, %s246_s8 }
  0x3b   :  { %290 = vmatpush3.bf16.msra.mxu1 %v289_v8  ;;  %p368_p10 = scmp.ne.s32.totalorder %s246_s8, %s367_s9  ;;  %p373_p12 = scmp.lt.s32.totalorder %s367_s9, %s367_s9 }
  0x3c   :  { %279 = vmatprep.subr.mxu1 %v402_v1 }
  0x3d   :  { %273 = vmatmul.mubr.msk.f32.vlgmr.msra.gmra.mrb[0].mxu0 %vm70_vm4, %v60_v5  ;;  %p374_p13 = por %p373_p12, %p372_p11 }
  0x3f   :  { %280 = vmatpush3.msk.msra.mxu1 %vm163_vm5, %v151_v9  ;;  %p375_p0 = pnand %p374_p13, %p368_p10 }
 0x110   :  { %v144_v11 = vpop.f32.mrb[0].mxu0 }
 0x111   :  { %v145_v12 = vadd.f32 %v255_v10, %v144_v11  ;;  %v274_v13 = vpop.f32.mrb[1].mxu0 }
 0x113   :  { %v148_v14 = vmax.f32 %v145_v12, 0.0 }
 0x115   :  { %282 = vmatmul.mubr.msk.f32.vlgmr.msra.gmra.mrb[0].mxu1 %vm159_vm6, %v148_v14 }
 0x1e8   :  { %v233_v16 = vpop.f32.mrb[0].mxu1 }
 0x1e9   :  { %v234_v17 = vadd.f32 %v258_v15, %v233_v16  ;;  %v283_v18 = vpop.f32.mrb[1].mxu1 }
 0x1eb   :  { %238 = vst.msk [vmem:[#allocation8] sm:$0xff] %vm237_vm7, %v234_v17 }
 0x1ec   :  { %378 = shalt.err (!%p375_p0)
}
 0x1ed   :  { %s379_s11 = scalar_lea.hbm %s500_s5, 128 }
 0x1ee   :  { %p380_p1 = scmp.ne.s32.totalorder %s500_s5, %s379_s11  ;;  %p383_p2 = scmp.lt.u32.totalorder %s379_s11, %s500_s5 }
 0x1f0   :  { %p385_p3 = pnand %p383_p2, %p380_p1 }
 0x1f2   :  { %388 = shalt.err (!%p385_p3)
}
 0x1f3   :  { %248 = dma.vmem_to_hbm [thread:$0]  %s246_s8, 128, %s500_s5, [#allocation4]  }
 0x1f4   :  { %393 = dma.done.wait [#allocation4], 128  }
 0x1f5   :  { %394 = vsyncadd [#allocation4], 4294967168 }
 0x1f6   :  { %252 = vsyncpa [#allocation3], 1 }
 0x1f7   :  { %253 = vsyncpa [#allocation6], 1 }
 0x1f8   :  { %254 = vsyncpa [#allocation4], 1 }

</bundles_post_ra>
